<compile_context>
chip_gen: v7x
topology: tpu7x:2x2x1
jax: 0.10.0
libtpu: 0.0.40
codegen_flags: <defaults>
</compile_context>

<pallas_src>
import jax
import jax.numpy as jnp
import numpy as np
from jax.experimental import pallas as pl
from jax.experimental.pallas import tpu as pltpu


# ------------------------------ Pallas kernel -------------------------------

def mlp_kernel(x_ref, w1, b1, w2, b2, w3, b3, w4, b4, o_ref):
    # x: (bm, Din); wN: (in, out); bN: (1, out); o: (bm, Dout).
    # All refs are VMEM-resident; the three hidden activations never leave
    # vregs/VMEM.
    h = jnp.dot(x_ref[...], w1[...], preferred_element_type=jnp.float32) + b1[...]
    h = jnp.maximum(h, 0.0)
    h = jnp.dot(h, w2[...], preferred_element_type=jnp.float32) + b2[...]
    h = jnp.maximum(h, 0.0)
    h = jnp.dot(h, w3[...], preferred_element_type=jnp.float32) + b3[...]
    h = jnp.maximum(h, 0.0)
    out = jnp.dot(h, w4[...], preferred_element_type=jnp.float32) + b4[...]
    # NOTE: for tiny output_size (<128) this is a masked store; at (B, 4) the
    # store volume is negligible so we keep the module's natural output shape.
    o_ref[...] = out.astype(o_ref.dtype)


def make_mlp_forward(B, input_size, hidden_size, output_size, *, batch_tile=1024):
    """Build the fused-MLP pallas_call wrapper for a fixed batch size B."""
    bm = min(B, batch_tile)
    grid = (pl.cdiv(B, bm),)

    def replicated(shape):
        # Whole-array (weight / bias) block, same block for every grid step.
        return pl.BlockSpec(shape, lambda i: (0,) * len(shape))

    in_specs = [
        pl.BlockSpec((bm, input_size), lambda i: (i, 0)),            # x
        replicated((input_size, hidden_size)), replicated((1, hidden_size)),   # layer 1
        replicated((hidden_size, hidden_size)), replicated((1, hidden_size)),  # layer 2
        replicated((hidden_size, hidden_size)), replicated((1, hidden_size)),  # layer 3
        replicated((hidden_size, output_size)), replicated((1, output_size)),  # layer 4
    ]
    out_spec = pl.BlockSpec((bm, output_size), lambda i: (i, 0))

    call = pl.pallas_call(
        mlp_kernel,
        out_shape=jax.ShapeDtypeStruct((B, output_size), jnp.float32),
        grid=grid,
        in_specs=in_specs,
        out_specs=out_spec,
        compiler_params=pltpu.CompilerParams(
            dimension_semantics=("parallel",),        # batch tiles are independent
            vmem_limit_bytes=32 * 1024 * 1024,
        ),
    )

    def forward(kernel_params, x):
        return call(x, *kernel_params)

    return forward


# --------------------------- parameters & reference -------------------------

def init_params(key, input_size, output_size, hidden_size, init_w=0.003):
    """Mirror the PyTorch module's initialization (weights stored (out, in))."""
    sizes = [(input_size, hidden_size),
             (hidden_size, hidden_size),
             (hidden_size, hidden_size),
             (hidden_size, output_size)]
    keys = jax.random.split(key, 2 * len(sizes))
    params = []
    for li, (fin, fout) in enumerate(sizes):
        # Last layer: uniform(-init_w, init_w); others: default nn.Linear init.
        bound = init_w if li == len(sizes) - 1 else 1.0 / np.sqrt(fin)
        w = jax.random.uniform(keys[2 * li], (fout, fin), jnp.float32, -bound, bound)
        b = jax.random.uniform(keys[2 * li + 1], (fout,), jnp.float32, -bound, bound)
        params.append((w, b))
    return params


def prepare_kernel_params(params):
    """Hoisted layout prep (done once, not per forward call):
    (out, in) -> (in, out) weights and (1, out) biases."""
    flat = []
    for w, b in params:
        flat.append(jnp.asarray(w.T))
        flat.append(b[None, :])
    return tuple(flat)


def mlp_ref(params, x):
    """Plain-JAX reference matching the PyTorch forward."""
    h = x
    for i, (w, b) in enumerate(params):
        h = h @ w.T + b
        if i < len(params) - 1:
            h = jax.nn.relu(h)
    return h


# ----------------------------------- main ------------------------------------

if __name__ == "__main__":
    B, input_size, hidden_size, output_size = 2, 32, 32, 4

    key = jax.random.PRNGKey(0)
    pkey, xkey = jax.random.split(key)
    params = init_params(pkey, input_size, output_size, hidden_size)
    kernel_params = prepare_kernel_params(params)
    x = jax.random.normal(xkey, (B, input_size), jnp.float32)

    forward = jax.jit(make_mlp_forward(B, input_size, hidden_size, output_size))
    out = jax.block_until_ready(forward(kernel_params, x))

    assert out.shape == (B, output_size), out.shape
    ref = mlp_ref(params, x)
    np.testing.assert_allclose(np.asarray(out), np.asarray(ref), rtol=2e-4, atol=2e-4)

    print("KERNEL_OK")
</pallas_src>

<mosaic_0001>
module attributes {stable_mosaic.version = 11 : i64} {
  func.func @mlp_kernel(%arg0: i32, %arg1: memref<2x32xf32, #tpu.memory_space<vmem>>, %arg2: memref<32x32xf32, #tpu.memory_space<vmem>>, %arg3: memref<1x32xf32, #tpu.memory_space<vmem>>, %arg4: memref<32x32xf32, #tpu.memory_space<vmem>>, %arg5: memref<1x32xf32, #tpu.memory_space<vmem>>, %arg6: memref<32x32xf32, #tpu.memory_space<vmem>>, %arg7: memref<1x32xf32, #tpu.memory_space<vmem>>, %arg8: memref<32x4xf32, #tpu.memory_space<vmem>>, %arg9: memref<1x4xf32, #tpu.memory_space<vmem>>, %arg10: memref<2x4xf32, #tpu.memory_space<vmem>>) attributes {dimension_semantics = [#tpu.dimension_semantics<parallel>], iteration_bounds = array<i64: 1>, scalar_prefetch = 0 : i64, scratch_operands = 0 : i64, tpu.core_type = #tpu.core_type<tc>, window_params = [{transform_indices = @transform_0, window_bounds = array<i64: 2, 32>}, {pipeline_mode = #tpu.pipeline_mode<synchronous>, transform_indices = @transform_1, window_bounds = array<i64: 32, 32>}, {pipeline_mode = #tpu.pipeline_mode<synchronous>, transform_indices = @transform_2, window_bounds = array<i64: 1, 32>}, {pipeline_mode = #tpu.pipeline_mode<synchronous>, transform_indices = @transform_3, window_bounds = array<i64: 32, 32>}, {pipeline_mode = #tpu.pipeline_mode<synchronous>, transform_indices = @transform_4, window_bounds = array<i64: 1, 32>}, {pipeline_mode = #tpu.pipeline_mode<synchronous>, transform_indices = @transform_5, window_bounds = array<i64: 32, 32>}, {pipeline_mode = #tpu.pipeline_mode<synchronous>, transform_indices = @transform_6, window_bounds = array<i64: 1, 32>}, {pipeline_mode = #tpu.pipeline_mode<synchronous>, transform_indices = @transform_7, window_bounds = array<i64: 32, 4>}, {pipeline_mode = #tpu.pipeline_mode<synchronous>, transform_indices = @transform_8, window_bounds = array<i64: 1, 4>}, {transform_indices = @transform_9, window_bounds = array<i64: 2, 4>}]} {
    %c0 = arith.constant 0 : index
    %c0_0 = arith.constant 0 : index
    %0 = vector.load %arg1[%c0, %c0_0] : memref<2x32xf32, #tpu.memory_space<vmem>>, vector<2x32xf32>
    %c0_1 = arith.constant 0 : index
    %c0_2 = arith.constant 0 : index
    %1 = vector.load %arg2[%c0_1, %c0_2] : memref<32x32xf32, #tpu.memory_space<vmem>>, vector<32x32xf32>
    %cst = arith.constant dense<0.000000e+00> : vector<2x32xf32>
    %2 = tpu.matmul %0, %1, %cst {dimension_numbers = #tpu.dot_dimension_numbers<[1], [0], [0], [1], [0, 0, 1, 1], [], []>} : vector<2x32xf32>, vector<32x32xf32>, vector<2x32xf32> -> vector<2x32xf32>
    %c0_3 = arith.constant 0 : index
    %c0_4 = arith.constant 0 : index
    %3 = vector.load %arg3[%c0_3, %c0_4] : memref<1x32xf32, #tpu.memory_space<vmem>>, vector<1x32xf32>
    %4 = vector.broadcast %3 : vector<1x32xf32> to vector<2x32xf32>
    %5 = arith.addf %2, %4 : vector<2x32xf32>
    %cst_5 = arith.constant 0.000000e+00 : f32
    %6 = vector.broadcast %cst_5 : f32 to vector<2x32xf32>
    %7 = arith.maximumf %5, %6 : vector<2x32xf32>
    %c0_6 = arith.constant 0 : index
    %c0_7 = arith.constant 0 : index
    %8 = vector.load %arg4[%c0_6, %c0_7] : memref<32x32xf32, #tpu.memory_space<vmem>>, vector<32x32xf32>
    %cst_8 = arith.constant dense<0.000000e+00> : vector<2x32xf32>
    %9 = tpu.matmul %7, %8, %cst_8 {dimension_numbers = #tpu.dot_dimension_numbers<[1], [0], [0], [1], [0, 0, 1, 1], [], []>} : vector<2x32xf32>, vector<32x32xf32>, vector<2x32xf32> -> vector<2x32xf32>
    %c0_9 = arith.constant 0 : index
    %c0_10 = arith.constant 0 : index
    %10 = vector.load %arg5[%c0_9, %c0_10] : memref<1x32xf32, #tpu.memory_space<vmem>>, vector<1x32xf32>
    %11 = vector.broadcast %10 : vector<1x32xf32> to vector<2x32xf32>
    %12 = arith.addf %9, %11 : vector<2x32xf32>
    %cst_11 = arith.constant 0.000000e+00 : f32
    %13 = vector.broadcast %cst_11 : f32 to vector<2x32xf32>
    %14 = arith.maximumf %12, %13 : vector<2x32xf32>
    %c0_12 = arith.constant 0 : index
    %c0_13 = arith.constant 0 : index
    %15 = vector.load %arg6[%c0_12, %c0_13] : memref<32x32xf32, #tpu.memory_space<vmem>>, vector<32x32xf32>
    %cst_14 = arith.constant dense<0.000000e+00> : vector<2x32xf32>
    %16 = tpu.matmul %14, %15, %cst_14 {dimension_numbers = #tpu.dot_dimension_numbers<[1], [0], [0], [1], [0, 0, 1, 1], [], []>} : vector<2x32xf32>, vector<32x32xf32>, vector<2x32xf32> -> vector<2x32xf32>
    %c0_15 = arith.constant 0 : index
    %c0_16 = arith.constant 0 : index
    %17 = vector.load %arg7[%c0_15, %c0_16] : memref<1x32xf32, #tpu.memory_space<vmem>>, vector<1x32xf32>
    %18 = vector.broadcast %17 : vector<1x32xf32> to vector<2x32xf32>
    %19 = arith.addf %16, %18 : vector<2x32xf32>
    %cst_17 = arith.constant 0.000000e+00 : f32
    %20 = vector.broadcast %cst_17 : f32 to vector<2x32xf32>
    %21 = arith.maximumf %19, %20 : vector<2x32xf32>
    %c0_18 = arith.constant 0 : index
    %c0_19 = arith.constant 0 : index
    %22 = vector.load %arg8[%c0_18, %c0_19] : memref<32x4xf32, #tpu.memory_space<vmem>>, vector<32x4xf32>
    %cst_20 = arith.constant dense<0.000000e+00> : vector<2x4xf32>
    %23 = tpu.matmul %21, %22, %cst_20 {dimension_numbers = #tpu.dot_dimension_numbers<[1], [0], [0], [1], [0, 0, 1, 1], [], []>} : vector<2x32xf32>, vector<32x4xf32>, vector<2x4xf32> -> vector<2x4xf32>
    %c0_21 = arith.constant 0 : index
    %c0_22 = arith.constant 0 : index
    %24 = vector.load %arg9[%c0_21, %c0_22] : memref<1x4xf32, #tpu.memory_space<vmem>>, vector<1x4xf32>
    %25 = vector.broadcast %24 : vector<1x4xf32> to vector<2x4xf32>
    %26 = arith.addf %23, %25 : vector<2x4xf32>
    %c0_23 = arith.constant 0 : index
    %c0_24 = arith.constant 0 : index
    %27 = vector.load %arg10[%c0_23, %c0_24] : memref<2x4xf32, #tpu.memory_space<vmem>>, vector<2x4xf32>
    tpu.vector_store %arg10[%c0_23, %c0_24], %26 {strides = array<i32>} : memref<2x4xf32, #tpu.memory_space<vmem>>, vector<2x4xf32>,
    return
  }
  func.func @transform_0(%arg0: i32) -> (i32, i32) {
    %c0_i32 = arith.constant 0 : i32
    %c0_i32_0 = arith.constant 0 : i32
    return %arg0, %c0_i32 : i32, i32
  }
  func.func @transform_1(%arg0: i32) -> (i32, i32) {
    %c0_i32 = arith.constant 0 : i32
    %c0_i32_0 = arith.constant 0 : i32
    %c0_i32_1 = arith.constant 0 : i32
    return %c0_i32, %c0_i32_0 : i32, i32
  }
  func.func @transform_2(%arg0: i32) -> (i32, i32) {
    %c0_i32 = arith.constant 0 : i32
    %c0_i32_0 = arith.constant 0 : i32
    %c0_i32_1 = arith.constant 0 : i32
    return %c0_i32, %c0_i32_0 : i32, i32
  }
  func.func @transform_3(%arg0: i32) -> (i32, i32) {
    %c0_i32 = arith.constant 0 : i32
    %c0_i32_0 = arith.constant 0 : i32
    %c0_i32_1 = arith.constant 0 : i32
    return %c0_i32, %c0_i32_0 : i32, i32
  }
  func.func @transform_4(%arg0: i32) -> (i32, i32) {
    %c0_i32 = arith.constant 0 : i32
    %c0_i32_0 = arith.constant 0 : i32
    %c0_i32_1 = arith.constant 0 : i32
    return %c0_i32, %c0_i32_0 : i32, i32
  }
  func.func @transform_5(%arg0: i32) -> (i32, i32) {
    %c0_i32 = arith.constant 0 : i32
    %c0_i32_0 = arith.constant 0 : i32
    %c0_i32_1 = arith.constant 0 : i32
    return %c0_i32, %c0_i32_0 : i32, i32
  }
  func.func @transform_6(%arg0: i32) -> (i32, i32) {
    %c0_i32 = arith.constant 0 : i32
    %c0_i32_0 = arith.constant 0 : i32
    %c0_i32_1 = arith.constant 0 : i32
    return %c0_i32, %c0_i32_0 : i32, i32
  }
  func.func @transform_7(%arg0: i32) -> (i32, i32) {
    %c0_i32 = arith.constant 0 : i32
    %c0_i32_0 = arith.constant 0 : i32
    %c0_i32_1 = arith.constant 0 : i32
    return %c0_i32, %c0_i32_0 : i32, i32
  }
  func.func @transform_8(%arg0: i32) -> (i32, i32) {
    %c0_i32 = arith.constant 0 : i32
    %c0_i32_0 = arith.constant 0 : i32
    %c0_i32_1 = arith.constant 0 : i32
    return %c0_i32, %c0_i32_0 : i32, i32
  }
  func.func @transform_9(%arg0: i32) -> (i32, i32) {
    %c0_i32 = arith.constant 0 : i32
    %c0_i32_0 = arith.constant 0 : i32
    return %arg0, %c0_i32 : i32, i32
  }
}

</mosaic_0001>

<bundles_post_ra>
// kernel: forward.1
= control target key start
LH: loop header
LB: loop body
LE: loop exit
PB: predicated region body
PF: predicated region fallthrough
CT: control target
= control target key end

     0   :  { %14 = vsyncpa [#allocation3], 0  ;;  %s737_s0 = inlined_call_operand.vmem [shape: f32[2,32], index: 0, kind: input, shape index: {}]   ;;  %s738_s1 = inlined_call_operand.vmem [shape: f32[32,32], index: 1, kind: input, shape index: {}]   ;;  %s739_s2 = inlined_call_operand.vmem [shape: f32[1,32], index: 2, kind: input, shape index: {}]   ;;  %s740_s3 = inlined_call_operand.hbm [shape: f32[32,32], index: 3, kind: input, shape index: {}]   ;;  %s741_s4 = inlined_call_operand.vmem [shape: f32[1,32], index: 4, kind: input, shape index: {}]   ;;  %s742_s5 = inlined_call_operand.hbm [shape: f32[32,32], index: 5, kind: input, shape index: {}]   ;;  %s743_s6 = inlined_call_operand.vmem [shape: f32[1,32], index: 6, kind: input, shape index: {}]   ;;  %s744_s7 = inlined_call_operand.vmem [shape: f32[32,4], index: 7, kind: input, shape index: {}]   ;;  %s745_s8 = inlined_call_operand.vmem [shape: f32[1,4], index: 8, kind: input, shape index: {}]   ;;  %s746_s9 = inlined_call_operand.hbm [shape: f32[2,4], index: 9, kind: output, shape index: {}]  }
   0x1   :  { %15 = vsyncpa [#allocation6], 0 }
   0x2   :  { %16 = vsyncpa [#allocation4], 0  ;;  %s596_s30 = smov [#allocation2]   ;;  %s524_s13 = scalar_lea.hbm %s740_s3, 512 }
   0x3   :  { %s28_s10 = sshll.u32 %s596_s30, 4  ;;  %p525_p0 = scmp.ne.s32.totalorder %s740_s3, %s524_s13  ;;  %s29_s10 = int_to_ptr.vmem [resolvable:$true] %s28_s10 }
   0x4   :  { %p528_p1 = scmp.lt.u32.totalorder %s524_s13, %s740_s3 }
   0x6   :  { %p530_p2 = pnand %p528_p1, %p525_p0 }
   0x8   :  { %533 = shalt.err (!%p530_p2)
}
   0x9   :  { %s534_s18 = scalar_lea.vmem %s29_s10, 512  ;;  %p539_p4 = scmp.lt.s32.totalorder %s29_s10, %s29_s10 }
   0xa   :  { %p535_p3 = scmp.ne.s32.totalorder %s29_s10, %s534_s18  ;;  %p540_p5 = scmp.lt.s32.totalorder %s534_s18, %s534_s18 }
   0xc   :  { %p541_p6 = por %p540_p5, %p539_p4 }
   0xe   :  { %p542_p7 = pnand %p541_p6, %p535_p3 }
  0x10   :  { %545 = shalt.err (!%p542_p7)
}
  0x11   :  { %s597_s19 = smov 128   ;;  %s598_s20 = smov 8  }
  0x12   :  { %34 = dma.hbm_to_vmem [thread:$0]  %s740_s3, 512, %s29_s10, [#allocation3], %s597_s19, %s597_s19, %s598_s20  }
  0x13   :  { %s599_s23 = smov [#allocation5]   ;;  %s546_s27 = scalar_lea.hbm %s742_s5, 512 }
  0x14   :  { %s42_s24 = sshll.u32 %s599_s23, 4  ;;  %p547_p8 = scmp.ne.s32.totalorder %s742_s5, %s546_s27  ;;  %s43_s24 = int_to_ptr.vmem [resolvable:$true] %s42_s24 }
  0x15   :  { %p550_p9 = scmp.lt.u32.totalorder %s546_s27, %s742_s5 }
  0x17   :  { %p552_p10 = pnand %p550_p9, %p547_p8 }
  0x19   :  { %555 = shalt.err (!%p552_p10)
}
  0x1a   :  { %s556_s12 = scalar_lea.vmem %s43_s24, 512  ;;  %p561_p12 = scmp.lt.s32.totalorder %s43_s24, %s43_s24 }
  0x1b   :  { %p557_p11 = scmp.ne.s32.totalorder %s43_s24, %s556_s12  ;;  %p562_p13 = scmp.lt.s32.totalorder %s556_s12, %s556_s12 }
  0x1d   :  { %p563_p0 = por %p562_p13, %p561_p12 }
  0x1f   :  { %p564_p1 = pnand %p563_p0, %p557_p11 }
  0x21   :  { %567 = shalt.err (!%p564_p1)
}
  0x22   :  { %48 = dma.hbm_to_vmem [thread:$0]  %s742_s5, 512, %s43_s24, [#allocation6], %s597_s19, %s597_s19, %s598_s20  }
  0x23   :  { %590 = dma.done.wait [#allocation3], 512  }
  0x24   :  { %591 = vsyncadd [#allocation3], 4294966784 }
  0x25   :  { %592 = dma.done.wait [#allocation6], 512  }
  0x26   :  { %593 = vsyncadd [#allocation6], 4294966784  ;;  %v600_v0 = vmov 0.0|0.0   ;;  %vm601_vm0 = vmmov 0   ;;  %v602_v1 = vmov 0.0   ;;  %v62_v2 = vld [vmem:[%s738_s1] sm:$0xff] }
  0x27   :  { %492 = vmatprep.subr.bf16.mxu0 %v600_v0  ;;  %456 = vmatprep.mubr.msk.f32.mxu0 %vm601_vm0, %v602_v1  ;;  %v63_v3 = vld [vmem:[%s738_s1 + $0x8] sm:$0xff]  ;;  %v64_v4 = vld [vmem:[%s738_s1 + $0x10] sm:$0xff]  ;;  %v65_v6 = vld [vmem:[%s738_s1 + $0x18] sm:$0xff]  ;;  %vm73_vm1 = vcmask 261120   ;;  %s603_s10 = smov [#allocation7]   ;;  %vm402_vm2 = vcmask 25600  }
  0x28   :  { %498 = vmatprep.subr.bf16.mxu1 %v600_v0  ;;  %467 = vmatprep.mubr.msk.f32.mxu1 %vm601_vm0, %v602_v1  ;;  %v493_v5 = vpack.c.bf16 %v63_v3, %v62_v2  ;;  %v148_v7 = vld [vmem:[#allocation2] sm:$0xff]  ;;  %v149_v8 = vld [vmem:[#allocation2 + $0x8] sm:$0xff]  ;;  %v496_v9 = vpack.c.bf16 %v65_v6, %v64_v4  ;;  %v150_v12 = vld [vmem:[#allocation2 + $0x10] sm:$0xff]  ;;  %s410_s13 = sshll.u32 %s603_s10, 4  ;;  %s411_s13 = int_to_ptr.vmem [resolvable:$true] %s410_s13 }
  0x29   :  { %v499_v10 = vpack.c.bf16 %v149_v8, %v148_v7  ;;  %v61_v11 = vld [vmem:[%s737_s0] sm:$0x3]  ;;  %v151_v13 = vld [vmem:[#allocation2 + $0x18] sm:$0xff]  ;;  %v234_v16 = vld [vmem:[#allocation5 + $0x8] sm:$0xff]  ;;  %p573_p3 = scmp.lt.s32.totalorder %s411_s13, %s411_s13 }
  0x2a   :  { %494 = vmatpush3.bf16.msra.mxu0 %v493_v5  ;;  %v502_v14 = vpack.c.bf16 %v151_v13, %v150_v12  ;;  %v233_v15 = vld [vmem:[#allocation5] sm:$0xff]  ;;  %v235_v23 = vld [vmem:[#allocation5 + $0x10] sm:$0xff]  ;;  %v236_v24 = vld [vmem:[#allocation5 + $0x18] sm:$0xff] }
  0x2b   :  { %495 = vmatprep.subr.bf16.mxu0 %v600_v0  ;;  %500 = vmatpush3.bf16.msra.mxu1 %v499_v10  ;;  %v505_v17 = vpack.c.bf16 %v234_v16, %v233_v15  ;;  %v420_v18 = vld [vmem:[%s739_s2] ss:$0 sm:$0xff]  ;;  %v508_v25 = vpack.c.bf16 %v236_v24, %v235_v23  ;;  %v319_v27 = vld [vmem:[%s744_s7 + $0x8] sm:$0xff]  ;;  %v320_v34 = vld [vmem:[%s744_s7 + $0x10] sm:$0xff] }
  0x2c   :  { %501 = vmatprep.subr.bf16.mxu1 %v600_v0  ;;  %v318_v26 = vld [vmem:[%s744_s7] sm:$0xff]  ;;  %v321_v35 = vld [vmem:[%s744_s7 + $0x18] sm:$0xff]  ;;  %s568_s7 = scalar_lea.vmem %s411_s13, 32 }
  0x2d   :  { %v511_v28 = vpack.c.bf16 %v319_v27, %v318_v26  ;;  %v422_v29 = vld [vmem:[%s741_s4] ss:$0 sm:$0xff]  ;;  %v514_v36 = vpack.c.bf16 %v321_v35, %v320_v34  ;;  %p569_p2 = scmp.ne.s32.totalorder %s411_s13, %s568_s7  ;;  %p574_p4 = scmp.lt.s32.totalorder %s568_s7, %s568_s7 }
  0x2e   :  { %497 = vmatpush3.bf16.msra.mxu0 %v496_v9  ;;  %v424_v37 = vld [vmem:[%s743_s6] ss:$0 sm:$0xff] }
  0x2f   :  { %504 = vmatprep.subr.bf16.mxu0 %v600_v0  ;;  %503 = vmatpush3.bf16.msra.mxu1 %v502_v14  ;;  %v426_v42 = vld [vmem:[%s745_s8] ss:$0 sm:$0xff]  ;;  %p575_p5 = por %p574_p4, %p573_p3 }
  0x30   :  { %510 = vmatprep.subr.bf16.mxu1 %v600_v0 }
  0x31   :  { %457 = vmatmul.mubr.msk.f32.vlgmr.msra.gmra.mrb[0].mxu0 %vm73_vm1, %v61_v11  ;;  %p576_p6 = pnand %p575_p5, %p569_p2 }
  0x32   :  { %478 = vmatprep.mubr.msk.f32.mxu0 %vm601_vm0, %v602_v1  ;;  %506 = vmatpush3.bf16.msra.mxu0 %v505_v17 }
  0x33   :  { %507 = vmatprep.subr.bf16.mxu0 %v600_v0 }
  0x36   :  { %509 = vmatpush3.bf16.msra.mxu0 %v508_v25 }
 0x104   :  { %v143_v19 = vpop.f32.mrb[0].mxu0 }
 0x105   :  { %v144_v20 = vadd.f32 %v420_v18, %v143_v19  ;;  %v458_v21 = vpop.f32.mrb[1].mxu0 }
 0x107   :  { %v147_v22 = vmax.f32 %v144_v20, 0.0 }
 0x109   :  { %468 = vmatmul.mubr.msk.f32.vlgmr.msra.gmra.mrb[0].mxu1 %vm73_vm1, %v147_v22 }
 0x10a   :  { %489 = vmatprep.mubr.msk.f32.mxu1 %vm601_vm0, %v602_v1  ;;  %512 = vmatpush3.bf16.msra.mxu1 %v511_v28 }
 0x10b   :  { %513 = vmatprep.subr.bf16.mxu1 %v600_v0 }
 0x10e   :  { %515 = vmatpush3.bf16.msra.mxu1 %v514_v36 }
 0x1dc   :  { %v228_v30 = vpop.f32.mrb[0].mxu1 }
 0x1dd   :  { %v229_v31 = vadd.f32 %v422_v29, %v228_v30  ;;  %v469_v32 = vpop.f32.mrb[1].mxu1 }
 0x1df   :  { %v232_v33 = vmax.f32 %v229_v31, 0.0 }
 0x1e1   :  { %479 = vmatmul.mubr.msk.f32.vlgmr.msra.gmra.mrb[2].mxu0 %vm73_vm1, %v232_v33 }
 0x2b4   :  { %v313_v38 = vpop.f32.mrb[2].mxu0 }
 0x2b5   :  { %v314_v39 = vadd.f32 %v424_v37, %v313_v38  ;;  %v480_v40 = vpop.f32.mrb[3].mxu0 }
 0x2b7   :  { %v317_v41 = vmax.f32 %v314_v39, 0.0 }
 0x2b9   :  { %490 = vmatmul.mubr.msk.f32.vlgmr.msra.gmra.mrb[2].mxu1 %vm73_vm1, %v317_v41 }
 0x38c   :  { %v398_v43 = vpop.f32.mrb[2].mxu1 }
 0x38d   :  { %v399_v44 = vadd.f32 %v426_v42, %v398_v43  ;;  %v491_v45 = vpop.f32.mrb[3].mxu1 }
 0x38f   :  { %403 = vst.msk [vmem:[#allocation7] sm:$0x3] %vm402_vm2, %v399_v44 }
 0x390   :  { %579 = shalt.err (!%p576_p6)
}
 0x391   :  { %s580_s15 = scalar_lea.hbm %s746_s9, 32 }
 0x392   :  { %p581_p7 = scmp.ne.s32.totalorder %s746_s9, %s580_s15  ;;  %p584_p8 = scmp.lt.u32.totalorder %s580_s15, %s746_s9 }
 0x394   :  { %p586_p9 = pnand %p584_p8, %p581_p7 }
 0x396   :  { %589 = shalt.err (!%p586_p9)
}
 0x397   :  { %413 = dma.vmem_to_hbm [thread:$0]  %s411_s13, 32, %s746_s9, [#allocation4]  }
 0x398   :  { %594 = dma.done.wait [#allocation4], 32  }
 0x399   :  { %595 = vsyncadd [#allocation4], 4294967264 }
 0x39a   :  { %417 = vsyncpa [#allocation3], 1 }
 0x39b   :  { %418 = vsyncpa [#allocation6], 1 }
 0x39c   :  { %419 = vsyncpa [#allocation4], 1 }

</bundles_post_ra>
